<compile_context>
chip_gen: v7x
topology: tpu7x:2x2x1
jax: 0.10.0
libtpu: 0.0.40
codegen_flags: <defaults>
</compile_context>

<pallas_src>
import functools
import math

import jax
import jax.numpy as jnp
import numpy as np
from jax import lax
from jax.experimental import pallas as pl
from jax.experimental.pallas import tpu as pltpu


def _mha_kernel(xq_ref, xk_ref, xv_ref, wq_ref, wk_ref, wv_ref,
                attn_ref, out_ref, *, num_heads):
    # xq_ref: (1, Lq, Dq) f32; w*_ref: (D, NH) bf16, pre-transposed,
    # 1/sqrt(dh) already folded into wq.
    xq = xq_ref[0].astype(jnp.bfloat16)        # (Lq, Dq)
    xk = xk_ref[0].astype(jnp.bfloat16)        # (Lk, Dk)
    xv = xv_ref[0].astype(jnp.bfloat16)        # (Lk, Dv)
    wq = wq_ref[...]                           # (Dq, NH)
    wk = wk_ref[...]                           # (Dk, NH)
    wv = wv_ref[...]                           # (Dv, NH)

    # Full-width projections: one MXU op each (f32 accumulation).
    q = jnp.dot(xq, wq, preferred_element_type=jnp.float32)   # (Lq, NH)
    k = jnp.dot(xk, wk, preferred_element_type=jnp.float32)   # (Lk, NH)
    v = jnp.dot(xv, wv, preferred_element_type=jnp.float32)   # (Lk, NH)

    nh = q.shape[-1]
    dh = nh // num_heads

    qb = q.astype(jnp.bfloat16)
    kb = k.astype(jnp.bfloat16)
    vb = v.astype(jnp.bfloat16)

    attn_parts = []
    out_parts = []
    # Static unrolled loop over heads (num_heads is a Python int).
    for h in range(num_heads):
        qh = qb[:, h * dh:(h + 1) * dh]        # (Lq, dh)
        kh = kb[:, h * dh:(h + 1) * dh]        # (Lk, dh)
        vh = vb[:, h * dh:(h + 1) * dh]        # (Lk, dh)

        # q @ k^T without materializing a transpose: contract last axes.
        scores = lax.dot_general(
            qh, kh, (((1,), (1,)), ((), ())),
            preferred_element_type=jnp.float32)                # (Lq, Lk)

        # Softmax in f32 (stable); divide via EUP approx reciprocal.
        m = jnp.max(scores, axis=-1, keepdims=True)
        e = jnp.exp(scores - m)
        denom = jnp.sum(e, axis=-1, keepdims=True)
        attn = e * pl.reciprocal(denom, approx=True)           # (Lq, Lk)

        attn_parts.append(attn)
        # dropout is identity at inference
        out_parts.append(jnp.dot(attn.astype(jnp.bfloat16), vh,
                                 preferred_element_type=jnp.float32))

    # Single lane-dense store per output.
    attn_ref[0] = jnp.concatenate(attn_parts, axis=-1).astype(attn_ref.dtype)
    out_ref[0] = jnp.concatenate(out_parts, axis=-1).astype(out_ref.dtype)


def multi_head_attention(xq, xk, xv, w_q, w_k, w_v, num_heads):
    """Returns (attention_weights (B*H, Lq, Lk), output (B*H, Lq, dh))."""
    B, Lq, Dq = xq.shape
    _, Lk, Dk = xk.shape
    _, Lv, Dv = xv.shape
    assert Lk == Lv
    H = num_heads
    num_hiddens = w_q.shape[0]
    assert num_hiddens % H == 0
    dh = num_hiddens // H

    # Pre-transpose weights to (D, NH); fold 1/sqrt(dh) into W_q; bf16 operands.
    wq_t = (w_q.T * (1.0 / math.sqrt(dh))).astype(jnp.bfloat16)
    wk_t = w_k.T.astype(jnp.bfloat16)
    wv_t = w_v.T.astype(jnp.bfloat16)

    grid = (B,)
    kernel = functools.partial(_mha_kernel, num_heads=H)

    in_specs = [
        pl.BlockSpec((1, Lq, Dq), lambda b: (b, 0, 0)),
        pl.BlockSpec((1, Lk, Dk), lambda b: (b, 0, 0)),
        pl.BlockSpec((1, Lv, Dv), lambda b: (b, 0, 0)),
        # Full weight matrices, constant block index -> loaded once, resident.
        pl.BlockSpec((Dq, num_hiddens), lambda b: (0, 0)),
        pl.BlockSpec((Dk, num_hiddens), lambda b: (0, 0)),
        pl.BlockSpec((Dv, num_hiddens), lambda b: (0, 0)),
    ]
    out_specs = [
        pl.BlockSpec((1, Lq, H * Lk), lambda b: (b, 0, 0)),
        pl.BlockSpec((1, Lq, num_hiddens), lambda b: (b, 0, 0)),
    ]
    out_shape = [
        jax.ShapeDtypeStruct((B, Lq, H * Lk), jnp.float32),
        jax.ShapeDtypeStruct((B, Lq, num_hiddens), jnp.float32),
    ]

    flops = 2 * B * (Lq * Dq * num_hiddens + Lk * Dk * num_hiddens
                     + Lv * Dv * num_hiddens) \
            + 4 * B * H * Lq * Lk * dh
    bytes_accessed = (4 * B * (Lq * Dq + Lk * Dk + Lv * Dv)
                      + 2 * (Dq + Dk + Dv) * num_hiddens
                      + 4 * B * (Lq * H * Lk + Lq * num_hiddens))
    transcendentals = B * H * Lq * Lk

    attn_packed, out_packed = pl.pallas_call(
        kernel,
        grid_spec=pltpu.PrefetchScalarGridSpec(
            num_scalar_prefetch=0,
            grid=grid,
            in_specs=in_specs,
            out_specs=out_specs,
        ),
        out_shape=out_shape,
        compiler_params=pltpu.CompilerParams(
            dimension_semantics=("parallel",)),
        cost_estimate=pl.CostEstimate(flops=flops,
                                      transcendentals=transcendentals,
                                      bytes_accessed=bytes_accessed),
    )(xq, xk, xv, wq_t, wk_t, wv_t)

    # Unpack lane-dense slabs to the module's (B*H, ...) layout (outside the
    # kernel; pure layout plumbing).
    attn = attn_packed.reshape(B, Lq, H, Lk).transpose(0, 2, 1, 3) \
                      .reshape(B * H, Lq, Lk)
    out = out_packed.reshape(B, Lq, H, dh).transpose(0, 2, 1, 3) \
                    .reshape(B * H, Lq, dh)
    return attn, out


def _reference(xq, xk, xv, w_q, w_k, w_v, num_heads):
    """Pure-JAX f32 reference mirroring the PyTorch module exactly."""
    def transpose_qkv(X, H):
        B, L, _ = X.shape
        X = X.reshape(B, L, H, -1)
        X = jnp.transpose(X, (0, 2, 1, 3))
        return X.reshape(B * H, L, -1)

    q = transpose_qkv(xq @ w_q.T, num_heads)
    k = transpose_qkv(xk @ w_k.T, num_heads)
    v = transpose_qkv(xv @ w_v.T, num_heads)
    d = q.shape[-1]
    scores = jnp.einsum("bqd,bkd->bqk", q, k) / math.sqrt(d)
    attn = jax.nn.softmax(scores, axis=-1)
    out = jnp.einsum("bqk,bkd->bqd", attn, v)
    return attn, out


if __name__ == "__main__":
    # Small shapes consistent with the module's forward.
    batch = 2
    seq_q = 8
    seq_k = 8
    query_size = key_size = value_size = 32
    num_hiddens = 32
    num_heads = 4
    # dropout=0.0 -> nn.Dropout is identity; valid_lens=None.
    # TODO(synk): valid_lens masking (repeat_interleave + sequence_mask) not exercised here.

    key = jax.random.PRNGKey(0)
    k1, k2, k3, k4, k5, k6 = jax.random.split(key, 6)
    xq = jax.random.normal(k1, (batch, seq_q, query_size), jnp.float32)
    xk = jax.random.normal(k2, (batch, seq_k, key_size), jnp.float32)
    xv = jax.random.normal(k3, (batch, seq_k, value_size), jnp.float32)

    # Deterministic "Linear" weights (out_features, in_features), bias=False.
    scale_q = 1.0 / math.sqrt(query_size)
    w_q = jax.random.uniform(k4, (num_hiddens, query_size), jnp.float32,
                             -scale_q, scale_q)
    scale_k = 1.0 / math.sqrt(key_size)
    w_k = jax.random.uniform(k5, (num_hiddens, key_size), jnp.float32,
                             -scale_k, scale_k)
    scale_v = 1.0 / math.sqrt(value_size)
    w_v = jax.random.uniform(k6, (num_hiddens, value_size), jnp.float32,
                             -scale_v, scale_v)

    attn, out = multi_head_attention(xq, xk, xv, w_q, w_k, w_v, num_heads)
    jax.block_until_ready((attn, out))

    attn_ref, out_ref = _reference(xq, xk, xv, w_q, w_k, w_v, num_heads)
    assert attn.shape == (batch * num_heads, seq_q, seq_k)
    assert out.shape == (batch * num_heads, seq_q, num_hiddens // num_heads)
    # Tolerance loosened vs the pure-f32 version: MXU operands are bf16
    # (accumulation and softmax remain f32) and the softmax divide uses the
    # EUP approx reciprocal.
    np.testing.assert_allclose(np.asarray(attn), np.asarray(attn_ref),
                               rtol=2e-2, atol=2e-2)
    np.testing.assert_allclose(np.asarray(out), np.asarray(out_ref),
                               rtol=2e-2, atol=2e-2)
    print("KERNEL_OK")
</pallas_src>

<mosaic_0001>
module attributes {stable_mosaic.version = 11 : i64} {
  func.func @_mha_kernel(%arg0: i32, %arg1: memref<1x8x32xf32, #tpu.memory_space<vmem>>, %arg2: memref<1x8x32xf32, #tpu.memory_space<vmem>>, %arg3: memref<1x8x32xf32, #tpu.memory_space<vmem>>, %arg4: memref<32x32xbf16, #tpu.memory_space<vmem>>, %arg5: memref<32x32xbf16, #tpu.memory_space<vmem>>, %arg6: memref<32x32xbf16, #tpu.memory_space<vmem>>, %arg7: memref<1x8x32xf32, #tpu.memory_space<vmem>>, %arg8: memref<1x8x32xf32, #tpu.memory_space<vmem>>) attributes {dimension_semantics = [#tpu.dimension_semantics<parallel>], iteration_bounds = array<i64: 2>, scalar_prefetch = 0 : i64, scratch_operands = 0 : i64, tpu.core_type = #tpu.core_type<tc>, window_params = [{transform_indices = @transform_0, window_bounds = array<i64: 1, 8, 32>}, {transform_indices = @transform_1, window_bounds = array<i64: 1, 8, 32>}, {transform_indices = @transform_2, window_bounds = array<i64: 1, 8, 32>}, {pipeline_mode = #tpu.pipeline_mode<synchronous>, transform_indices = @transform_3, window_bounds = array<i64: 32, 32>}, {pipeline_mode = #tpu.pipeline_mode<synchronous>, transform_indices = @transform_4, window_bounds = array<i64: 32, 32>}, {pipeline_mode = #tpu.pipeline_mode<synchronous>, transform_indices = @transform_5, window_bounds = array<i64: 32, 32>}, {transform_indices = @transform_6, window_bounds = array<i64: 1, 8, 32>}, {transform_indices = @transform_7, window_bounds = array<i64: 1, 8, 32>}]} {
    %c0 = arith.constant 0 : index
    %c0_0 = arith.constant 0 : index
    %c0_1 = arith.constant 0 : index
    %0 = vector.load %arg1[%c0, %c0_0, %c0_1] : memref<1x8x32xf32, #tpu.memory_space<vmem>>, vector<1x8x32xf32>
    %1 = vector.shape_cast %0 : vector<1x8x32xf32> to vector<8x32xf32>
    %2 = arith.truncf %1 : vector<8x32xf32> to vector<8x32xbf16>
    %c0_2 = arith.constant 0 : index
    %c0_3 = arith.constant 0 : index
    %c0_4 = arith.constant 0 : index
    %3 = vector.load %arg2[%c0_2, %c0_3, %c0_4] : memref<1x8x32xf32, #tpu.memory_space<vmem>>, vector<1x8x32xf32>
    %4 = vector.shape_cast %3 : vector<1x8x32xf32> to vector<8x32xf32>
    %5 = arith.truncf %4 : vector<8x32xf32> to vector<8x32xbf16>
    %c0_5 = arith.constant 0 : index
    %c0_6 = arith.constant 0 : index
    %c0_7 = arith.constant 0 : index
    %6 = vector.load %arg3[%c0_5, %c0_6, %c0_7] : memref<1x8x32xf32, #tpu.memory_space<vmem>>, vector<1x8x32xf32>
    %7 = vector.shape_cast %6 : vector<1x8x32xf32> to vector<8x32xf32>
    %8 = arith.truncf %7 : vector<8x32xf32> to vector<8x32xbf16>
    %c0_8 = arith.constant 0 : index
    %c0_9 = arith.constant 0 : index
    %9 = vector.load %arg4[%c0_8, %c0_9] : memref<32x32xbf16, #tpu.memory_space<vmem>>, vector<32x32xbf16>
    %c0_10 = arith.constant 0 : index
    %c0_11 = arith.constant 0 : index
    %10 = vector.load %arg5[%c0_10, %c0_11] : memref<32x32xbf16, #tpu.memory_space<vmem>>, vector<32x32xbf16>
    %c0_12 = arith.constant 0 : index
    %c0_13 = arith.constant 0 : index
    %11 = vector.load %arg6[%c0_12, %c0_13] : memref<32x32xbf16, #tpu.memory_space<vmem>>, vector<32x32xbf16>
    %cst = arith.constant dense<0.000000e+00> : vector<8x32xf32>
    %12 = tpu.matmul %2, %9, %cst {dimension_numbers = #tpu.dot_dimension_numbers<[1], [0], [0], [1], [0, 0, 1, 1], [], []>} : vector<8x32xbf16>, vector<32x32xbf16>, vector<8x32xf32> -> vector<8x32xf32>
    %cst_14 = arith.constant dense<0.000000e+00> : vector<8x32xf32>
    %13 = tpu.matmul %5, %10, %cst_14 {dimension_numbers = #tpu.dot_dimension_numbers<[1], [0], [0], [1], [0, 0, 1, 1], [], []>} : vector<8x32xbf16>, vector<32x32xbf16>, vector<8x32xf32> -> vector<8x32xf32>
    %cst_15 = arith.constant dense<0.000000e+00> : vector<8x32xf32>
    %14 = tpu.matmul %8, %11, %cst_15 {dimension_numbers = #tpu.dot_dimension_numbers<[1], [0], [0], [1], [0, 0, 1, 1], [], []>} : vector<8x32xbf16>, vector<32x32xbf16>, vector<8x32xf32> -> vector<8x32xf32>
    %15 = arith.truncf %12 : vector<8x32xf32> to vector<8x32xbf16>
    %16 = arith.truncf %13 : vector<8x32xf32> to vector<8x32xbf16>
    %17 = arith.truncf %14 : vector<8x32xf32> to vector<8x32xbf16>
    %18 = vector.extract_strided_slice %15 {offsets = [0, 0], sizes = [8, 8], strides = [1, 1]} : vector<8x32xbf16> to vector<8x8xbf16>
    %19 = vector.extract_strided_slice %16 {offsets = [0, 0], sizes = [8, 8], strides = [1, 1]} : vector<8x32xbf16> to vector<8x8xbf16>
    %20 = vector.extract_strided_slice %17 {offsets = [0, 0], sizes = [8, 8], strides = [1, 1]} : vector<8x32xbf16> to vector<8x8xbf16>
    %cst_16 = arith.constant dense<0.000000e+00> : vector<8x8xf32>
    %21 = tpu.matmul %18, %19, %cst_16 {dimension_numbers = #tpu.dot_dimension_numbers<[1], [1], [0], [0], [0, 0, 1, 0], [], []>} : vector<8x8xbf16>, vector<8x8xbf16>, vector<8x8xf32> -> vector<8x8xf32>
    %cst_17 = arith.constant dense<0xFF800000> : vector<8xf32>
    %22 = vector.multi_reduction <maximumf>, %21, %cst_17 [1] : vector<8x8xf32> to vector<8xf32>
    %23 = vector.shape_cast %22 : vector<8xf32> to vector<8x1xf32>
    %24 = vector.broadcast %23 : vector<8x1xf32> to vector<8x8xf32>
    %25 = arith.subf %21, %24 : vector<8x8xf32>
    %26 = math.exp %25 : vector<8x8xf32>
    %cst_18 = arith.constant dense<0.000000e+00> : vector<8xf32>
    %27 = vector.multi_reduction <add>, %26, %cst_18 [1] : vector<8x8xf32> to vector<8xf32>
    %28 = vector.shape_cast %27 : vector<8xf32> to vector<8x1xf32>
    %29 = tpu.reciprocal %28 {approx = true} : vector<8x1xf32> -> vector<8x1xf32>
    %30 = vector.broadcast %29 : vector<8x1xf32> to vector<8x8xf32>
    %31 = arith.mulf %26, %30 : vector<8x8xf32>
    %32 = arith.truncf %31 : vector<8x8xf32> to vector<8x8xbf16>
    %cst_19 = arith.constant dense<0.000000e+00> : vector<8x8xf32>
    %33 = tpu.matmul %32, %20, %cst_19 {dimension_numbers = #tpu.dot_dimension_numbers<[1], [0], [0], [1], [0, 0, 1, 1], [], []>} : vector<8x8xbf16>, vector<8x8xbf16>, vector<8x8xf32> -> vector<8x8xf32>
    %34 = vector.extract_strided_slice %15 {offsets = [0, 8], sizes = [8, 8], strides = [1, 1]} : vector<8x32xbf16> to vector<8x8xbf16>
    %35 = vector.extract_strided_slice %16 {offsets = [0, 8], sizes = [8, 8], strides = [1, 1]} : vector<8x32xbf16> to vector<8x8xbf16>
    %36 = vector.extract_strided_slice %17 {offsets = [0, 8], sizes = [8, 8], strides = [1, 1]} : vector<8x32xbf16> to vector<8x8xbf16>
    %cst_20 = arith.constant dense<0.000000e+00> : vector<8x8xf32>
    %37 = tpu.matmul %34, %35, %cst_20 {dimension_numbers = #tpu.dot_dimension_numbers<[1], [1], [0], [0], [0, 0, 1, 0], [], []>} : vector<8x8xbf16>, vector<8x8xbf16>, vector<8x8xf32> -> vector<8x8xf32>
    %cst_21 = arith.constant dense<0xFF800000> : vector<8xf32>
    %38 = vector.multi_reduction <maximumf>, %37, %cst_21 [1] : vector<8x8xf32> to vector<8xf32>
    %39 = vector.shape_cast %38 : vector<8xf32> to vector<8x1xf32>
    %40 = vector.broadcast %39 : vector<8x1xf32> to vector<8x8xf32>
    %41 = arith.subf %37, %40 : vector<8x8xf32>
    %42 = math.exp %41 : vector<8x8xf32>
    %cst_22 = arith.constant dense<0.000000e+00> : vector<8xf32>
    %43 = vector.multi_reduction <add>, %42, %cst_22 [1] : vector<8x8xf32> to vector<8xf32>
    %44 = vector.shape_cast %43 : vector<8xf32> to vector<8x1xf32>
    %45 = tpu.reciprocal %44 {approx = true} : vector<8x1xf32> -> vector<8x1xf32>
    %46 = vector.broadcast %45 : vector<8x1xf32> to vector<8x8xf32>
    %47 = arith.mulf %42, %46 : vector<8x8xf32>
    %48 = arith.truncf %47 : vector<8x8xf32> to vector<8x8xbf16>
    %cst_23 = arith.constant dense<0.000000e+00> : vector<8x8xf32>
    %49 = tpu.matmul %48, %36, %cst_23 {dimension_numbers = #tpu.dot_dimension_numbers<[1], [0], [0], [1], [0, 0, 1, 1], [], []>} : vector<8x8xbf16>, vector<8x8xbf16>, vector<8x8xf32> -> vector<8x8xf32>
    %50 = vector.extract_strided_slice %15 {offsets = [0, 16], sizes = [8, 8], strides = [1, 1]} : vector<8x32xbf16> to vector<8x8xbf16>
    %51 = vector.extract_strided_slice %16 {offsets = [0, 16], sizes = [8, 8], strides = [1, 1]} : vector<8x32xbf16> to vector<8x8xbf16>
    %52 = vector.extract_strided_slice %17 {offsets = [0, 16], sizes = [8, 8], strides = [1, 1]} : vector<8x32xbf16> to vector<8x8xbf16>
    %cst_24 = arith.constant dense<0.000000e+00> : vector<8x8xf32>
    %53 = tpu.matmul %50, %51, %cst_24 {dimension_numbers = #tpu.dot_dimension_numbers<[1], [1], [0], [0], [0, 0, 1, 0], [], []>} : vector<8x8xbf16>, vector<8x8xbf16>, vector<8x8xf32> -> vector<8x8xf32>
    %cst_25 = arith.constant dense<0xFF800000> : vector<8xf32>
    %54 = vector.multi_reduction <maximumf>, %53, %cst_25 [1] : vector<8x8xf32> to vector<8xf32>
    %55 = vector.shape_cast %54 : vector<8xf32> to vector<8x1xf32>
    %56 = vector.broadcast %55 : vector<8x1xf32> to vector<8x8xf32>
    %57 = arith.subf %53, %56 : vector<8x8xf32>
    %58 = math.exp %57 : vector<8x8xf32>
    %cst_26 = arith.constant dense<0.000000e+00> : vector<8xf32>
    %59 = vector.multi_reduction <add>, %58, %cst_26 [1] : vector<8x8xf32> to vector<8xf32>
    %60 = vector.shape_cast %59 : vector<8xf32> to vector<8x1xf32>
    %61 = tpu.reciprocal %60 {approx = true} : vector<8x1xf32> -> vector<8x1xf32>
    %62 = vector.broadcast %61 : vector<8x1xf32> to vector<8x8xf32>
    %63 = arith.mulf %58, %62 : vector<8x8xf32>
    %64 = arith.truncf %63 : vector<8x8xf32> to vector<8x8xbf16>
    %cst_27 = arith.constant dense<0.000000e+00> : vector<8x8xf32>
    %65 = tpu.matmul %64, %52, %cst_27 {dimension_numbers = #tpu.dot_dimension_numbers<[1], [0], [0], [1], [0, 0, 1, 1], [], []>} : vector<8x8xbf16>, vector<8x8xbf16>, vector<8x8xf32> -> vector<8x8xf32>
    %66 = vector.extract_strided_slice %15 {offsets = [0, 24], sizes = [8, 8], strides = [1, 1]} : vector<8x32xbf16> to vector<8x8xbf16>
    %67 = vector.extract_strided_slice %16 {offsets = [0, 24], sizes = [8, 8], strides = [1, 1]} : vector<8x32xbf16> to vector<8x8xbf16>
    %68 = vector.extract_strided_slice %17 {offsets = [0, 24], sizes = [8, 8], strides = [1, 1]} : vector<8x32xbf16> to vector<8x8xbf16>
    %cst_28 = arith.constant dense<0.000000e+00> : vector<8x8xf32>
    %69 = tpu.matmul %66, %67, %cst_28 {dimension_numbers = #tpu.dot_dimension_numbers<[1], [1], [0], [0], [0, 0, 1, 0], [], []>} : vector<8x8xbf16>, vector<8x8xbf16>, vector<8x8xf32> -> vector<8x8xf32>
    %cst_29 = arith.constant dense<0xFF800000> : vector<8xf32>
    %70 = vector.multi_reduction <maximumf>, %69, %cst_29 [1] : vector<8x8xf32> to vector<8xf32>
    %71 = vector.shape_cast %70 : vector<8xf32> to vector<8x1xf32>
    %72 = vector.broadcast %71 : vector<8x1xf32> to vector<8x8xf32>
    %73 = arith.subf %69, %72 : vector<8x8xf32>
    %74 = math.exp %73 : vector<8x8xf32>
    %cst_30 = arith.constant dense<0.000000e+00> : vector<8xf32>
    %75 = vector.multi_reduction <add>, %74, %cst_30 [1] : vector<8x8xf32> to vector<8xf32>
    %76 = vector.shape_cast %75 : vector<8xf32> to vector<8x1xf32>
    %77 = tpu.reciprocal %76 {approx = true} : vector<8x1xf32> -> vector<8x1xf32>
    %78 = vector.broadcast %77 : vector<8x1xf32> to vector<8x8xf32>
    %79 = arith.mulf %74, %78 : vector<8x8xf32>
    %80 = arith.truncf %79 : vector<8x8xf32> to vector<8x8xbf16>
    %cst_31 = arith.constant dense<0.000000e+00> : vector<8x8xf32>
    %81 = tpu.matmul %80, %68, %cst_31 {dimension_numbers = #tpu.dot_dimension_numbers<[1], [0], [0], [1], [0, 0, 1, 1], [], []>} : vector<8x8xbf16>, vector<8x8xbf16>, vector<8x8xf32> -> vector<8x8xf32>
    %82 = tpu.concatenate %31, %47, %63, %79 in 1 : vector<8x8xf32>, vector<8x8xf32>, vector<8x8xf32>, vector<8x8xf32> -> vector<8x32xf32>
    %c0_32 = arith.constant 0 : index
    %c0_33 = arith.constant 0 : index
    %c0_34 = arith.constant 0 : index
    %83 = vector.load %arg7[%c0_32, %c0_33, %c0_34] : memref<1x8x32xf32, #tpu.memory_space<vmem>>, vector<1x8x32xf32>
    %84 = vector.shape_cast %83 : vector<1x8x32xf32> to vector<8x32xf32>
    %85 = vector.shape_cast %82 : vector<8x32xf32> to vector<1x8x32xf32>
    tpu.vector_store %arg7[%c0_32, %c0_33, %c0_34], %85 {strides = array<i32>} : memref<1x8x32xf32, #tpu.memory_space<vmem>>, vector<1x8x32xf32>,
    %86 = tpu.concatenate %33, %49, %65, %81 in 1 : vector<8x8xf32>, vector<8x8xf32>, vector<8x8xf32>, vector<8x8xf32> -> vector<8x32xf32>
    %c0_35 = arith.constant 0 : index
    %c0_36 = arith.constant 0 : index
    %c0_37 = arith.constant 0 : index
    %87 = vector.load %arg8[%c0_35, %c0_36, %c0_37] : memref<1x8x32xf32, #tpu.memory_space<vmem>>, vector<1x8x32xf32>
    %88 = vector.shape_cast %87 : vector<1x8x32xf32> to vector<8x32xf32>
    %89 = vector.shape_cast %86 : vector<8x32xf32> to vector<1x8x32xf32>
    tpu.vector_store %arg8[%c0_35, %c0_36, %c0_37], %89 {strides = array<i32>} : memref<1x8x32xf32, #tpu.memory_space<vmem>>, vector<1x8x32xf32>,
    return
  }
  func.func @transform_0(%arg0: i32) -> (i32, i32, i32) {
    %c0_i32 = arith.constant 0 : i32
    %c0_i32_0 = arith.constant 0 : i32
    %c0_i32_1 = arith.constant 0 : i32
    return %arg0, %c0_i32, %c0_i32_0 : i32, i32, i32
  }
  func.func @transform_1(%arg0: i32) -> (i32, i32, i32) {
    %c0_i32 = arith.constant 0 : i32
    %c0_i32_0 = arith.constant 0 : i32
    %c0_i32_1 = arith.constant 0 : i32
    return %arg0, %c0_i32, %c0_i32_0 : i32, i32, i32
  }
  func.func @transform_2(%arg0: i32) -> (i32, i32, i32) {
    %c0_i32 = arith.constant 0 : i32
    %c0_i32_0 = arith.constant 0 : i32
    %c0_i32_1 = arith.constant 0 : i32
    return %arg0, %c0_i32, %c0_i32_0 : i32, i32, i32
  }
  func.func @transform_3(%arg0: i32) -> (i32, i32) {
    %c0_i32 = arith.constant 0 : i32
    %c0_i32_0 = arith.constant 0 : i32
    %c0_i32_1 = arith.constant 0 : i32
    return %c0_i32, %c0_i32_0 : i32, i32
  }
  func.func @transform_4(%arg0: i32) -> (i32, i32) {
    %c0_i32 = arith.constant 0 : i32
    %c0_i32_0 = arith.constant 0 : i32
    %c0_i32_1 = arith.constant 0 : i32
    return %c0_i32, %c0_i32_0 : i32, i32
  }
  func.func @transform_5(%arg0: i32) -> (i32, i32) {
    %c0_i32 = arith.constant 0 : i32
    %c0_i32_0 = arith.constant 0 : i32
    %c0_i32_1 = arith.constant 0 : i32
    return %c0_i32, %c0_i32_0 : i32, i32
  }
  func.func @transform_6(%arg0: i32) -> (i32, i32, i32) {
    %c0_i32 = arith.constant 0 : i32
    %c0_i32_0 = arith.constant 0 : i32
    %c0_i32_1 = arith.constant 0 : i32
    return %arg0, %c0_i32, %c0_i32_0 : i32, i32, i32
  }
  func.func @transform_7(%arg0: i32) -> (i32, i32, i32) {
    %c0_i32 = arith.constant 0 : i32
    %c0_i32_0 = arith.constant 0 : i32
    %c0_i32_1 = arith.constant 0 : i32
    return %arg0, %c0_i32, %c0_i32_0 : i32, i32, i32
  }
}

</mosaic_0001>

<bundles_post_ra>
// kernel: tpu_custom_call.1
= control target key start
LH: loop header
LB: loop body
LE: loop exit
PB: predicated region body
PF: predicated region fallthrough
CT: control target
= control target key end

     0   :  { %s2255_s0 = inlined_call_operand.hbm [shape: f32[2,8,32], index: 0, kind: input, shape index: {}]   ;;  %s2256_s1 = inlined_call_operand.hbm [shape: f32[2,8,32], index: 1, kind: input, shape index: {}]   ;;  %s2257_s2 = inlined_call_operand.hbm [shape: f32[2,8,32], index: 2, kind: input, shape index: {}]   ;;  %s2258_s3 = inlined_call_operand.hbm [shape: bf16[32,32], index: 3, kind: input, shape index: {}]   ;;  %s2259_s4 = inlined_call_operand.hbm [shape: bf16[32,32], index: 4, kind: input, shape index: {}]   ;;  %s2260_s5 = inlined_call_operand.vmem [shape: bf16[32,32], index: 5, kind: input, shape index: {}]   ;;  %s2261_s6 = inlined_call_operand.hbm [shape: f32[2,8,32], index: 6, kind: output, shape index: {0}]   ;;  %s2262_s7 = inlined_call_operand.hbm [shape: f32[2,8,32], index: 7, kind: output, shape index: {1}]  }
   0x1   :  { %2280 = sst [smem:[#allocation22_spill]] %s2256_s1 }
   0x2   :  { %2281 = sst [smem:[#allocation23_spill]] %s2258_s3 }
   0x3   :  { %13 = vsyncpa [#allocation3], 0 }
   0x4   :  { %15 = vsyncpa [#allocation3 + $0x1], 0 }
   0x5   :  { %16 = vsyncpa [#allocation6], 0 }
   0x6   :  { %18 = vsyncpa [#allocation6 + $0x1], 0 }
   0x7   :  { %19 = vsyncpa [#allocation9], 0 }
   0x8   :  { %20 = vsyncpa [#allocation4], 0 }
   0x9   :  { %22 = vsyncpa [#allocation4 + $0x1], 0 }
   0xa   :  { %23 = vsyncpa [#allocation13], 0 }
   0xb   :  { %25 = vsyncpa [#allocation13 + $0x1], 0  ;;  %s1826_s24 = smov 0   ;;  %s1828_s25 = smov 0  }
   0xc   :  { %s1830_s26 = smov 0   ;;  %s1832_s27 = smov 0  }
   0xd LB: > { %2282 = sst [smem:[#allocation19_spill]] %s1767_s27  ;;  %s1847_s28 = sadd.s32 4294967295, %s1767_s27   ;;  %s1767_s27 = sphi %s1832_s27, %s2312_s27   ;;  %s1763_s26 = sphi %s1830_s26, %s2316_s26   ;;  %s1759_s25 = sphi %s1828_s25, %s2315_s25   ;;  %s1755_s24 = sphi %s1826_s24, %s2314_s24  }
   0xe   : > { %s1262_s29 = sadd.s32 4294967294, %s1767_s27   ;;  %p51_p0 = scmp.ne.s32.totalorder %s1759_s25, %s1755_s24 }
   0xf   : > { %p2263_p1 = scmp.eq.s32.totalorder %s1847_s28, 0  ;;  %p196_p3 = scmp.eq.s32.totalorder %s1262_s29, 1 }
  0x10   : > { %p1263_p5 = scmp.ge.s32.totalorder %s1767_s27, 1  ;;  %p229_p7 = scmp.lt.s32.totalorder %s1767_s27, 3 }
  0x11   : > { %p1856_p4 = por %p2263_p1, %p51_p0  ;;  %p1861_p6 = por %p196_p3, %p51_p0 }
  0x12   : > { %p1866_p8 = pnand %p1263_p5, %p229_p7  ;;  %s1769_s10 = smov [#allocation8]  }
  0x13   : > { %s2283_s30 = scalar_select %p1856_p4, 1, 0 }
  0x14   : > { %s2284_s8 = scalar_select %p1861_p6, 1, 0 }
  0x15   : > { %s2285_s9 = scalar_select %p1866_p8, 1, 0 }
  0x16   : > { %s241_s11 = sshll.u32 %s1769_s10, 4  ;;  %p1419_p9 = pneg %p1866_p8  ;;  %s1870_s11 = int_to_ptr.vmem [resolvable:$true] %s241_s11 }
  0x17   : > { %s1882_s13 = sadd.s32 1, %s1767_s27   ;;  %s38_s14 = sadd.s32 1, %s1763_s26 }
  0x18   : > { %p1877_p11 = pnand %p1419_p9, %p2263_p1  ;;  %2287 = sst [smem:[#allocation20_spill]] %s1882_s13 }
  0x19   : > { %s35_s15 = ssub.s32 %s1767_s27, %s1882_s13  ;;  %s2288_s3 = sld [smem:[#allocation23_spill]] }
  0x1a   : > { %s2286_s12 = scalar_select %p1877_p11, 1, 0 }
  0x1b   : > { %p2269_p13 = pneg %p1877_p11 }
  0x1f   : > { %s1515_s18 = scalar_lea.hbm %s2288_s3, 256 }
  0x20   : > { %p1516_p12 = scmp.ne.s32.totalorder %s2288_s3, %s1515_s18  ;;  %p1522_p5 = scmp.lt.u32.totalorder %s1515_s18, %s2288_s3 }
  0x22   : > { %p1518_p0 = pnand %p2269_p13, %p1516_p12 }
  0x24   : > { %p1519_p3 = pneg %p1518_p0 }
  0x26   : > { %p1524_p7 = pnand %p1522_p5, %p1519_p3 }
  0x28   : > { %1527 = shalt.err (!%p1524_p7)
}
  0x29   : > { %s1528_s23 = scalar_lea.vmem %s1870_s11, 256  ;;  %p1536_p2 = scmp.lt.s32.totalorder %s1870_s11, %s1870_s11 }
  0x2a   : > { %p1529_p9 = scmp.ne.s32.totalorder %s1870_s11, %s1528_s23  ;;  %p1537_p12 = scmp.lt.s32.totalorder %s1528_s23, %s1528_s23 }
  0x2c   : > { %p1531_p10 = pnand %p1529_p9, %p2269_p13  ;;  %p1538_p0 = por %p1537_p12, %p1536_p2 }
  0x2e   : > { %p1532_p1 = pneg %p1531_p10 }
  0x30   : > { %p1539_p6 = pnand %p1538_p0, %p1532_p1 }
  0x32   : > { %1542 = shalt.err (!%p1539_p6)
}
  0x33   : > { %s2264_s29 = smov 64   ;;  %s2266_s10 = smov 4  }
  0x34   : > { %1422 = dma.hbm_to_vmem [thread:$0]  (!%p1877_p11), %s2288_s3, 256, %s1870_s11, [#allocation9], %s2264_s29, %s2264_s29, %s2266_s10  }
  0x35   : > { %p36_p1 = scmp.eq.s32.totalorder %s35_s15, 0  ;;  %p45_p2 = scmp.ne.s32.totalorder %s1763_s26, %s1759_s25 }
  0x36   : > { %p46_p6 = scmp.eq.s32.totalorder %s1767_s27, 0  ;;  %p1445_p10 = scmp.lt.s32.totalorder %s1767_s27, 2 }
  0x37   : > { %s1922_s18 = scalar_select %p36_p1, %s1763_s26, %s38_s14  }
  0x38   : > { %p47_p3 = por %p46_p6, %p45_p2  ;;  %p2290_p5 = scmp.eq.s32.totalorder %s1847_s28, 1 }
  0x39   : > { %2289 = sst [smem:[#allocation21_spill]] %s1922_s18  ;;  %s2265_s20 = sand.u32 1, %s1763_s26  }
  0x3a   : > { %p1926_p7 = por %p2290_p5, %p45_p2  ;;  %s1932_s21 = sshll.u32 %s1767_s27, 7 }
  0x3b   : > { %s1936_s22 = sshll.u32 %s2265_s20, 3  ;;  %p1938_p9 = pnand %p1445_p10, %p47_p3 }
  0x3c   : > { %s2291_s19 = scalar_select %p1926_p7, 1, 0 }
  0x3d   : > { %s2292_s11 = scalar_select %p1938_p9, 1, 0 }
  0x3e   : > { %s289_s14 = sand.u32 1, %s1767_s27   ;;  %s2293_s1 = sld [smem:[#allocation22_spill]] }
  0x3f   : > { %s293_s17 = scalar_lea.vmem [#allocation5], %s1936_s22  ;;  %s1952_s20 = scalar_lea.sflag [#allocation6], %s289_s14 }
  0x40   : > { %s300_s29 = sshll.u32 %s293_s17, 4  ;;  %p1958_p0 = pneg %p1938_p9  ;;  %s1950_s29 = int_to_ptr.vmem [resolvable:$true] %s300_s29 }
  0x42   : > { %s2294_s3 = scalar_select %p1958_p0, 1, 0 }
  0x44   : > { %s1947_s16 = scalar_lea.hbm %s2293_s1, %s1932_s21  ;;  %s1548_s18 = scalar_lea.hbm %s2293_s1, 256 }
  0x45   : > { %s1543_s10 = scalar_lea.hbm %s1947_s16, 128  ;;  %p1549_p6 = scmp.lt.u32.totalorder %s1947_s16, %s2293_s1 }
  0x46   : > { %p1544_p12 = scmp.ne.s32.totalorder %s1947_s16, %s1543_s10  ;;  %p1550_p10 = scmp.lt.u32.totalorder %s1548_s18, %s1543_s10 }
  0x47   : > { %p1552_p5 = scmp.lt.u32.totalorder %s1543_s10, %s1947_s16 }
  0x48   : > { %p1546_p1 = pnand %p1958_p0, %p1544_p12  ;;  %p1551_p3 = por %p1550_p10, %p1549_p6 }
  0x4a   : > { %p1547_p2 = pneg %p1546_p1  ;;  %p1553_p13 = por %p1552_p5, %p1551_p3 }
  0x4c   : > { %p1554_p7 = pnand %p1553_p13, %p1547_p2 }
  0x4e   : > { %1557 = shalt.err (!%p1554_p7)
}
  0x4f   : > { %s1558_s14 = scalar_lea.vmem %s1950_s29, 128  ;;  %s1772_s15 = smov [#allocation5]  }
  0x50   : > { %p1559_p12 = scmp.ne.s32.totalorder %s1950_s29, %s1558_s14  ;;  %s1563_s23 = sshll.u32 %s1772_s15, 4  ;;  %s1564_s23 = int_to_ptr.vmem [resolvable:$false] %s1563_s23 }
  0x51   : > { %s1565_s13 = scalar_lea.vmem %s1564_s23, 256  ;;  %p1566_p8 = scmp.lt.s32.totalorder %s1950_s29, %s1564_s23 }
  0x52   : > { %p1561_p1 = pnand %p1559_p12, %p1958_p0  ;;  %p1567_p11 = scmp.lt.s32.totalorder %s1565_s13, %s1558_s14 }
  0x54   : > { %p1562_p4 = pneg %p1561_p1  ;;  %p1568_p6 = por %p1567_p11, %p1566_p8 }
  0x56   : > { %p1569_p10 = pnand %p1568_p6, %p1562_p4 }
  0x58   : > { %1572 = shalt.err (!%p1569_p10)
}
  0x59   : > { %1432 = dma.hbm_to_vmem [thread:$0]  (!%p1938_p9), %s1947_s16, 128, %s1950_s29, %s1952_s20  }
  0x5a   : > { %s1773_s10 = smov [#allocation10]   ;;  %s1573_s15 = scalar_lea.hbm %s2259_s4, 256 }
  0x5b   : > { %s254_s18 = sshll.u32 %s1773_s10, 4  ;;  %p1574_p8 = scmp.ne.s32.totalorder %s2259_s4, %s1573_s15  ;;  %s255_s18 = int_to_ptr.vmem [resolvable:$true] %s254_s18 }
  0x5c   : > { %p2295_p4 = scmp.ne.s32.totalorder %s2286_s12, 0  ;;  %p1580_p2 = scmp.lt.u32.totalorder %s1573_s15, %s2259_s4 }
  0x5e   : > { %p2296_p11 = pneg %p2295_p4 }
  0x60   : > { %p1576_p13 = pnand %p1574_p8, %p2296_p11 }
  0x62   : > { %p1577_p7 = pneg %p1576_p13 }
  0x64   : > { %p1582_p3 = pnand %p1580_p2, %p1577_p7 }
  0x66   : > { %1585 = shalt.err (!%p1582_p3)
}
  0x67   : > { %s1586_s29 = scalar_lea.vmem %s255_s18, 256  ;;  %p2297_p12 = pmov %p2296_p11 }
  0x68   : > { %p1587_p5 = scmp.ne.s32.totalorder %s255_s18, %s1586_s29  ;;  %p1594_p10 = scmp.lt.s32.totalorder %s255_s18, %s255_s18 }
  0x69   : > { %p1595_p9 = scmp.lt.s32.totalorder %s1586_s29, %s1586_s29 }
  0x6a   : > { %p1589_p1 = pnand %p1587_p5, %p2297_p12 }
  0x6b   : > { %p1596_p0 = por %p1595_p9, %p1594_p10 }
  0x6c   : > { %p1590_p6 = pneg %p1589_p1 }
  0x6e   : > { %p1597_p8 = pnand %p1596_p0, %p1590_p6 }
  0x70   : > { %1600 = shalt.err (!%p1597_p8)
}
  0x71   : > { %s2298_s1 = smov 4   ;;  %s2299_s27 = smov 64  }
  0x72   : > { %1425 = dma.hbm_to_vmem [thread:$0]  (!%p2295_p4), %s2259_s4, 256, %s255_s18, [#allocation9], %s2299_s27, %s2299_s27, %s2298_s1  }
  0x73   : > { %s2009_s23 = scalar_lea.hbm %s2255_s0, %s1932_s21  ;;  %s275_s12 = scalar_lea.vmem [#allocation2], %s1936_s22 }
  0x74   : > { %s282_s14 = sshll.u32 %s275_s12, 4  ;;  %s2300_s13 = sand.u32 1, %s1763_s26   ;;  %s283_s14 = int_to_ptr.vmem [resolvable:$true] %s282_s14 }
  0x75   : > { %s272_s29 = scalar_lea.sflag [#allocation3], %s2300_s13  ;;  %s1601_s16 = scalar_lea.hbm %s2009_s23, 128 }
  0x76   : > { %p1602_p9 = scmp.ne.s32.totalorder %s2009_s23, %s1601_s16  ;;  %p2301_p0 = scmp.ne.s32.totalorder %s2294_s3, 0 }
  0x77   : > { %s1606_s27 = scalar_lea.hbm %s2255_s0, 256  ;;  %p1607_p4 = scmp.lt.u32.totalorder %s2009_s23, %s2255_s0 }
  0x78   : > { %p1604_p11 = pnand %p1602_p9, %p2301_p0  ;;  %p1608_p7 = scmp.lt.u32.totalorder %s1606_s27, %s1601_s16 }
  0x79   : > { %p1610_p3 = scmp.lt.u32.totalorder %s1601_s16, %s2009_s23 }
  0x7a   : > { %p1605_p13 = pneg %p1604_p11  ;;  %p1609_p2 = por %p1608_p7, %p1607_p4 }
  0x7c   : > { %p1611_p5 = por %p1610_p3, %p1609_p2 }
  0x7e   : > { %p1612_p12 = pnand %p1611_p5, %p1605_p13 }
  0x80   : > { %1615 = shalt.err (!%p1612_p12)
}
  0x81   : > { %s1616_s15 = scalar_lea.vmem %s283_s14, 128  ;;  %s1774_s12 = smov [#allocation2]  }
  0x82   : > { %p1617_p1 = scmp.ne.s32.totalorder %s283_s14, %s1616_s15  ;;  %s1621_s13 = sshll.u32 %s1774_s12, 4  ;;  %s1622_s13 = int_to_ptr.vmem [resolvable:$false] %s1621_s13 }
  0x83   : > { %s1623_s18 = scalar_lea.vmem %s1622_s13, 256  ;;  %p1624_p8 = scmp.lt.s32.totalorder %s283_s14, %s1622_s13 }
  0x84   : > { %p1619_p6 = pnand %p1617_p1, %p2301_p0  ;;  %p1625_p9 = scmp.lt.s32.totalorder %s1623_s18, %s1616_s15 }
  0x86   : > { %p1620_p10 = pneg %p1619_p6  ;;  %p1626_p11 = por %p1625_p9, %p1624_p8 }
  0x88   : > { %p1627_p4 = pnand %p1626_p11, %p1620_p10 }
  0x8a   : > { %1630 = shalt.err (!%p1627_p4)
}
  0x8b   : > { %p2302_p7 = scmp.ne.s32.totalorder %s2292_s11, 0  ;;  %s2035_s27 = scalar_lea.hbm %s2257_s2, %s1932_s21 }
  0x8c   : > { %s311_s10 = scalar_lea.vmem [#allocation7], %s1936_s22  ;;  %s1631_s15 = scalar_lea.hbm %s2035_s27, 128 }
  0x8d   : > { %1429 = dma.hbm_to_vmem [thread:$0]  (!%p2302_p7), %s2009_s23, 128, %s283_s14, %s272_s29  }
  0x8e   : > { %s318_s17 = sshll.u32 %s311_s10, 4  ;;  %p1632_p13 = scmp.ne.s32.totalorder %s2035_s27, %s1631_s15  ;;  %s319_s17 = int_to_ptr.vmem [resolvable:$true] %s318_s17 }
  0x8f   : > { %s1636_s23 = scalar_lea.hbm %s2257_s2, 256  ;;  %p1637_p5 = scmp.lt.u32.totalorder %s2035_s27, %s2257_s2 }
  0x90   : > { %p1634_p2 = pnand %p1632_p13, %p2301_p0  ;;  %p1638_p12 = scmp.lt.u32.totalorder %s1636_s23, %s1631_s15 }
  0x91   : > { %p1640_p6 = scmp.lt.u32.totalorder %s1631_s15, %s2035_s27 }
  0x92   : > { %p1635_p3 = pneg %p1634_p2  ;;  %p1639_p1 = por %p1638_p12, %p1637_p5 }
  0x94   : > { %p1641_p10 = por %p1640_p6, %p1639_p1 }
  0x96   : > { %p1642_p8 = pnand %p1641_p10, %p1635_p3 }
  0x98   : > { %1645 = shalt.err (!%p1642_p8)
}
  0x99   : > { %s1646_s21 = scalar_lea.vmem %s319_s17, 128  ;;  %s1775_s22 = smov [#allocation7]  }
  0x9a   : > { %p1647_p9 = scmp.ne.s32.totalorder %s319_s17, %s1646_s21  ;;  %s1651_s18 = sshll.u32 %s1775_s22, 4  ;;  %s1652_s18 = int_to_ptr.vmem [resolvable:$false] %s1651_s18 }
  0x9b   : > { %s1653_s16 = scalar_lea.vmem %s1652_s18, 256  ;;  %p1654_p13 = scmp.lt.s32.totalorder %s319_s17, %s1652_s18 }
  0x9c   : > { %p1649_p11 = pnand %p1647_p9, %p2301_p0  ;;  %p1655_p2 = scmp.lt.s32.totalorder %s1653_s16, %s1646_s21 }
  0x9e   : > { %p1650_p4 = pneg %p1649_p11  ;;  %p1656_p7 = por %p1655_p2, %p1654_p13 }
  0xa0   : > { %p1657_p5 = pnand %p1656_p7, %p1650_p4 }
  0xa2   : > { %1660 = shalt.err (!%p1657_p5)
}
  0xa3   : > { %p2303_p12 = scmp.ne.s32.totalorder %s2292_s11, 0  ;;  %p2304_p3 = scmp.ne.s32.totalorder %s2285_s9, 0 }
  0xa4   : > { %s2059_s3 = sand.u32 (!%p2304_p3), 1, %s1759_s25   ;;  %p2305_p0 = scmp.ne.s32.totalorder (!%p2304_p3), %s2283_s30, 0 }
  0xa5   : > { %1435 = dma.hbm_to_vmem [thread:$0]  (!%p2303_p12), %s2035_s27, 128, %s319_s17, %s1952_s20  }
  0xa6   : > { %327 = sbr.rel (%p2304_p3) target bundleno = 1417 (0x589), region = 44  ;;  %s2062_s1 = sshll.u32 (!%p2304_p3), %s2059_s3, 3 }
  0xa7   : > { %s330_s10 = scalar_lea.sflag (!%p2304_p3), [#allocation3], %s2059_s3  ;;  %s333_s15 = scalar_lea.vmem (!%p2304_p3), [#allocation2], %s2062_s1 }
  0xad   : > { %1734 = dma.done.wait (%p2305_p0), %s330_s10, 128  }
  0xae   : > { %1736 = vsyncadd (%p2305_p0), %s330_s10, 4294967168  ;;  %s338_s9 = sand.u32 1, %s1847_s28   ;;  %s342_s11 = scalar_lea.vmem [#allocation5], %s2062_s1 }
  0xaf   : > { %s339_s20 = scalar_lea.sflag [#allocation6], %s338_s9 }
  0xb0   : > { %1738 = dma.done.wait (%p2305_p0), %s339_s20, 256  }
  0xb1   : > { %1740 = vsyncadd (%p2305_p0), %s339_s20, 4294967040  ;;  %s351_s27 = scalar_lea.vmem [#allocation7], %s2062_s1  ;;  %p2306_p7 = scmp.eq.s32.totalorder %s1847_s28, 0 }
  0xb3   : > { %1742 = dma.done.wait (%p2306_p7), [#allocation9], 512   ;;  %p2307_p1 = pmov %p2306_p7 }
  0xb4   : > { %v1776_v0 = vmov 0.0   ;;  %vm1777_vm0 = vmmov 0   ;;  %v1493_v1 = vld [vmem:[#allocation10] sm:$0xff]   ;;  %v1494_v2 = vld [vmem:[#allocation8] sm:$0xff]   ;;  %v1495_v3 = vld [vmem:[#allocation10 + $0x8] sm:$0xff]   ;;  %vm436_vm1 = vcmask 261120  }
  0xb5   : > { %1744 = vsyncadd (%p2307_p1), [#allocation9], 4294966784  ;;  %1337 = vmatprep.subr.bf16.mxu1 %v1776_v0  ;;  %1329 = vmatprep.subr.bf16.mxu0 %v1776_v0  ;;  %v408_v4 = vld [vmem:[%s342_s11] sm:$0xff]  ;;  %v406_v6 = vld [vmem:[%s333_s15] sm:$0xff]  ;;  %vm593_vm2 = vcmask 64512   ;;  %s1778_s30 = smov 112  }
  0xb6   : > { %1341 = vmatprep.mubr.msk.bf16.mxu1 %vm1777_vm0, %v1776_v0  ;;  %1333 = vmatprep.mubr.msk.bf16.mxu0 %vm1777_vm0, %v1776_v0  ;;  %v1496_v5 = vld [vmem:[#allocation8 + $0x8] sm:$0xff]   ;;  %v409_v7 = vpack.c.bf16 %v408_v4, %v408_v4  ;;  %v407_v8 = vpack.c.bf16 %v406_v6, %v406_v6  ;;  %s1779_s17 = smov 120   ;;  %s1780_s12 = smov 104   ;;  %v1497_v20 = vld [vmem:[%s2260_s5] sm:$0xff]   ;;  %v1498_v21 = vld [vmem:[%s2260_s5 + $0x8] sm:$0xff]   ;;  %vm655_vm3 = vcmask 1043456  }
  0xb7   : > { %1338 = vmatpush3.bf16.msra.mxu1 %v1493_v1  ;;  %1330 = vmatpush3.bf16.msra.mxu0 %v1494_v2  ;;  %v410_v22 = vld [vmem:[%s351_s27] sm:$0xff]  ;;  %s1781_s21 = smov 8   ;;  %s1782_s22 = smov 16   ;;  %vm1045_vm4 = vcmask 130048   ;;  %vm1047_vm5 = vcmask 195584  }
  0xb8   : > { %1339 = vmatprep.subr.bf16.mxu1 %v1776_v0  ;;  %1331 = vmatprep.subr.bf16.mxu0 %v1776_v0  ;;  %v411_v23 = vpack.c.bf16 %v410_v22, %v410_v22  ;;  %s1783_s18 = smov 24   ;;  %s397_s16 = scalar_lea.vmem [#allocation11], %s2062_s1 }
  0xb9   : > { %s1300_s10 = sshll.u32 %s1847_s28, 7  ;;  %s1085_s11 = sshll.u32 %s397_s16, 4  ;;  %s1086_s11 = int_to_ptr.vmem [resolvable:$true] %s1085_s11 }
  0xba   : > { %s2178_s20 = scalar_lea.hbm %s2261_s6, %s1300_s10  ;;  %s1067_s27 = scalar_lea.sflag [#allocation4], %s2059_s3 }
  0xbb   : > { %1340 = vmatpush3.bf16.msra.mxu1 %v1495_v3  ;;  %1332 = vmatpush3.bf16.msra.mxu0 %v1496_v5  ;;  %p2308_p10 = scmp.ne.s32.totalorder %s2291_s19, 0 }
  0xbc   : > { %1353 = vmatprep.subr.bf16.mxu1 %v1776_v0  ;;  %1345 = vmatprep.subr.bf16.mxu0 %v1776_v0 }
  0xbe   : > { %1342 = vmatmul.mubr.msk.bf16.vlgmr.msra.gmra.mrb[0].mxu1 %vm436_vm1, %v409_v7  ;;  %1334 = vmatmul.mubr.msk.bf16.vlgmr.msra.gmra.mrb[0].mxu0 %vm436_vm1, %v407_v8 }
  0xbf   : > { %1355 = vmatprep.mubr.msk.bf16.mxu1 %vm1777_vm0, %v1776_v0  ;;  %1349 = vmatprep.mubr.msk.bf16.mxu0 %vm1777_vm0, %v1776_v0 }
  0xc0   : > { %1346 = vmatpush3.bf16.msra.mxu0 %v1497_v20 }
  0xc1   : > { %1347 = vmatprep.subr.bf16.mxu0 %v1776_v0 }
  0xc4   : > { %1348 = vmatpush3.bf16.msra.mxu0 %v1498_v21 }
  0xc5   : > { %1359 = vmatprep.subr.bf16.mxu0 %v1776_v0 }
  0xc7   : > { %1350 = vmatmul.mubr.msk.bf16.vlgmr.msra.gmra.mrb[4].mxu0 %vm436_vm1, %v411_v23 }
  0xc8   : > { %1361 = vmatprep.mubr.msk.bf16.mxu0 %vm1777_vm0, %v1776_v0 }
 0x191   : > { %v529_v9 = vpop.f32.mrb[0].mxu1  ;;  %v474_v12 = vpop.f32.mrb[0].mxu0 }
 0x192   : > { %v591_v10 = vpack.c.bf16 %v529_v9, %v529_v9  ;;  %v1343_v11 = vpop.f32.mrb[1].mxu1  ;;  %v1335_v14 = vpop.f32.mrb[1].mxu0  ;;  %v590_v16 = vpack.c.bf16 %v474_v12, %v474_v12 }
 0x193   : > { %v532_v13 = vpop.f32.mrb[2].mxu1  ;;  %v477_v18 = vpop.f32.mrb[2].mxu0 }
 0x194   : > { %814 = vrot.lane.b32.xlu1 %v591_v10, %s1778_s30  ;;  %703 = vrot.lane.b32.xlu0 %v591_v10, %s1779_s17  ;;  %v1344_v15 = vpop.f32.mrb[3].mxu1  ;;  %v598_v17 = vsel %vm593_vm2, %v591_v10, 0  ;;  %v1336_v19 = vpop.f32.mrb[3].mxu0 }
 0x195   : > { %1354 = vmatpush3.bf16.xpose.msra.mxu1 %v598_v17 }
 0x196   : > { %1365 = vmatprep.subr.bf16.mxu1 %v1776_v0 }
 0x198   : > { %812 = vrot.lane.b32.xlu1 %v590_v16, %s1778_s30  ;;  %700 = vrot.lane.b32.xlu0 %v590_v16, %s1779_s17 }
 0x19a   : > { %v584_v38 = vpop.f32.mrb[4].mxu0 }
 0x19b   : > { %v592_v39 = vpack.c.bf16 %v584_v38, %v584_v38  ;;  %v1351_v40 = vpop.f32.mrb[5].mxu0 }
 0x19c   : > { %922 = vrot.lane.b32.xlu1 %v590_v16, %s1780_s12  ;;  %924 = vrot.lane.b32.xlu0 %v591_v10, %s1780_s12  ;;  %v587_v41 = vpop.f32.mrb[6].mxu0 }
 0x19d   : > { %1356 = vmatmul.mubr.msk.bf16.vlgmr.msra.gmra.mrb[4].mxu1 %vm593_vm2, %v590_v16  ;;  %v1352_v42 = vpop.f32.mrb[7].mxu0  ;;  %v657_v43 = vsel %vm655_vm3, %v592_v39, 0 }
 0x19e   : > { %1367 = vmatprep.mubr.msk.bf16.mxu1 %vm1777_vm0, %v1776_v0  ;;  %1360 = vmatpush3.bf16.msra.mxu0 %v657_v43 }
 0x19f   : > { %1371 = vmatprep.subr.bf16.mxu0 %v1776_v0 }
 0x206   : > { %v704_v24 = vpop.permute.xlu0 %703  ;;  %v815_v26 = vpop.permute.xlu1 %814 }
 0x207   : > { %v709_v25 = vsel %vm593_vm2, %v704_v24, 0  ;;  %v820_v28 = vsel %vm593_vm2, %v815_v26, 0 }
 0x208   : > { %1366 = vmatpush3.bf16.xpose.msra.mxu1 %v709_v25 }
 0x209   : > { %1377 = vmatprep.subr.bf16.mxu1 %v1776_v0 }
 0x20a   : > { %v701_v27 = vpop.permute.xlu0 %700  ;;  %v813_v30 = vpop.permute.xlu1 %812 }
 0x20e   : > { %v925_v29 = vpop.permute.xlu0 %924  ;;  %v923_v32 = vpop.permute.xlu1 %922 }
 0x20f   : > { %1368 = vmatmul.mubr.msk.bf16.vlgmr.msra.gmra.mrb[8].mxu1 %vm593_vm2, %v701_v27  ;;  %v930_v31 = vsel %vm593_vm2, %v925_v29, 0 }
 0x210   : > { %1378 = vmatpush3.bf16.xpose.msra.mxu1 %v820_v28  ;;  %1379 = vmatprep.mubr.msk.bf16.mxu1 %vm1777_vm0, %v1776_v0 }
 0x211   : > { %1389 = vmatprep.subr.bf16.mxu1 %v1776_v0 }
 0x217   : > { %1380 = vmatmul.mubr.msk.bf16.vlgmr.msra.gmra.mrb[12].mxu1 %vm593_vm2, %v813_v30 }
 0x218   : > { %1390 = vmatpush3.bf16.xpose.msra.mxu1 %v930_v31  ;;  %1391 = vmatprep.mubr.msk.bf16.mxu1 %vm1777_vm0, %v1776_v0 }
 0x21f   : > { %1392 = vmatmul.mubr.msk.bf16.vlgmr.msra.gmra.mrb[16].mxu1 %vm593_vm2, %v923_v32 }
 0x270   : > { %v634_v33 = vpop.f32.mrb[4].mxu1 }
 0x271   : > { %v1357_v34 = vpop.f32.mrb[5].mxu1  ;;  %v640_v35 = vsel %vm593_vm2, %v634_v33, -inf }
 0x272   : > { %641 = vmax.xlane.f32.xlu0 %v640_v35  ;;  %v637_v36 = vpop.f32.mrb[6].mxu1 }
 0x273   : > { %v1358_v37 = vpop.f32.mrb[7].mxu1 }
 0x2e2   : > { %v745_v44 = vpop.f32.mrb[8].mxu1 }
 0x2e3   : > { %v1369_v45 = vpop.f32.mrb[9].mxu1  ;;  %v751_v46 = vsel %vm593_vm2, %v745_v44, -inf }
 0x2e4   : > { %752 = vmax.xlane.f32.xlu1 %v751_v46  ;;  %v748_v47 = vpop.f32.mrb[10].mxu1 }
 0x2e5   : > { %v1370_v48 = vpop.f32.mrb[11].mxu1 }
 0x2ea   : > { %v856_v49 = vpop.f32.mrb[12].mxu1 }
 0x2eb   : > { %v1381_v50 = vpop.f32.mrb[13].mxu1  ;;  %v862_v51 = vsel %vm593_vm2, %v856_v49, -inf }
 0x2ec   : > { %863 = vmax.xlane.f32.xlu0 %v862_v51  ;;  %v859_v52 = vpop.f32.mrb[14].mxu1 }
 0x2ed   : > { %v1382_v53 = vpop.f32.mrb[15].mxu1 }
 0x2f2   : > { %v966_v54 = vpop.f32.mrb[16].mxu1 }
 0x2f3   : > { %v1393_v55 = vpop.f32.mrb[17].mxu1  ;;  %v972_v56 = vsel %vm593_vm2, %v966_v54, -inf }
 0x2f4   : > { %973 = vmax.xlane.f32.xlu0 %v972_v56  ;;  %v969_v57 = vpop.f32.mrb[18].mxu1 }
 0x2f5   : > { %v1394_v58 = vpop.f32.mrb[19].mxu1 }
 0x2ff   : > { %v642_v59 = vpop.xlane.xlu0 %641 }
 0x300   : > { %v643_v60 = vsub.f32 %v634_v33, %v642_v59 }
 0x302   : > { %v644_v61 = vmul.f32 1.442695, %v643_v60 }
 0x304   : > { %1499 = vpow2.f32 %v644_v61 }
 0x30e   : > { %v1500_v62 = vpop.eup %1499 }
 0x30f   : > { %v646_v63 = vsel %vm593_vm2, %v1500_v62, 0.0 }
 0x310   : > { %647 = vadd.xlane.f32.xlu1 %v646_v63 }
 0x321   : > { %764 = vrot.lane.b32.xlu1 %v592_v39, %s1779_s17  ;;  %s1784_s17 = smov [#allocation11]  }
 0x371   : > { %v753_v1 = vpop.xlane.xlu1 %752 }
 0x372   : > { %v754_v2 = vsub.f32 %v745_v44, %v753_v1 }
 0x374   : > { %v755_v3 = vmul.f32 1.442695, %v754_v2 }
 0x376   : > { %1501 = vpow2.f32 %v755_v3 }
 0x379   : > { %v864_v4 = vpop.xlane.xlu0 %863 }
 0x37a   : > { %v865_v5 = vsub.f32 %v856_v49, %v864_v4 }
 0x37c   : > { %v866_v6 = vmul.f32 1.442695, %v865_v5 }
 0x37e   : > { %1503 = vpow2.f32 %v866_v6 }
 0x380   : > { %v1502_v7 = vpop.eup %1501 }
 0x381   : > { %v974_v8 = vpop.xlane.xlu0 %973  ;;  %v757_v9 = vsel %vm593_vm2, %v1502_v7, 0.0 }
 0x382   : > { %v975_v10 = vsub.f32 %v966_v54, %v974_v8  ;;  %758 = vadd.xlane.f32.xlu0 %v757_v9 }
 0x384   : > { %v976_v11 = vmul.f32 1.442695, %v975_v10 }
 0x386   : > { %1505 = vpow2.f32 %v976_v11 }
 0x388   : > { %v1504_v12 = vpop.eup %1503 }
 0x389   : > { %v868_v13 = vsel %vm593_vm2, %v1504_v12, 0.0 }
 0x38a   : > { %869 = vadd.xlane.f32.xlu1 %v868_v13 }
 0x390   : > { %v1506_v14 = vpop.eup %1505 }
 0x391   : > { %v978_v15 = vsel %vm593_vm2, %v1506_v14, 0.0 }
 0x392   : > { %979 = vadd.xlane.f32.xlu0 %v978_v15 }
 0x39b   : > { %984 = vrot.lane.b32.xlu1 %v592_v39, %s1780_s12  ;;  %s1665_s12 = sshll.u32 %s1784_s17, 4  ;;  %s1666_s12 = int_to_ptr.vmem [resolvable:$false] %s1665_s12 }
 0x39c   : > { %s1667_s13 = scalar_lea.vmem %s1666_s12, 256  ;;  %p1668_p11 = scmp.lt.s32.totalorder %s1086_s11, %s1666_s12 }
 0x39d   : > { %v648_v16 = vpop.xlane.xlu1 %647 }
 0x39e   : > { %1507 = vrcp.f32 %v648_v16 }
 0x3a1   : > { %v765_v18 = vpop.permute.xlu1 %764 }
 0x3a2   : > { %v770_v21 = vsel %vm655_vm3, %v765_v18, 0 }
 0x3a8   : > { %v1508_v17 = vpop.eup %1507  ;;  %874 = vrot.lane.b32.xlu0 %v592_v39, %s1778_s30  ;;  %s1661_s30 = scalar_lea.vmem %s1086_s11, 128 }
 0x3a9   : > { %v650_v19 = vmul.f32 %v1508_v17, %v1500_v62  ;;  %p1662_p6 = scmp.ne.s32.totalorder %s1086_s11, %s1661_s30  ;;  %p1669_p4 = scmp.lt.s32.totalorder %s1667_s13, %s1661_s30 }
 0x3ab   : > { %v651_v20 = vpack.c.bf16 %v650_v19, %v650_v19  ;;  %p1663_p8 = pnand %p1662_p6, %p2308_p10  ;;  %p1670_p13 = por %p1669_p4, %p1668_p11 }
 0x3ad   : > { %1362 = vmatmul.mubr.msk.bf16.vlgmr.msra.gmra.mrb[8].mxu0 %vm593_vm2, %v651_v20  ;;  %p1664_p9 = pneg %p1663_p8 }
 0x3ae   : > { %1372 = vmatpush3.bf16.msra.mxu0 %v770_v21  ;;  %1373 = vmatprep.mubr.msk.bf16.mxu0 %vm1777_vm0, %v1776_v0 }
 0x3af   : > { %1383 = vmatprep.subr.bf16.mxu0 %v1776_v0  ;;  %p1671_p2 = pnand %p1670_p13, %p1664_p9 }
 0x40f   : > { %v759_v22 = vpop.xlane.xlu0 %758 }
 0x410   : > { %1509 = vrcp.f32 %v759_v22 }
 0x417   : > { %v870_v23 = vpop.xlane.xlu1 %869 }
 0x418   : > { %1511 = vrcp.f32 %v870_v23 }
 0x41a   : > { %v1510_v24 = vpop.eup %1509 }
 0x41b   : > { %v761_v25 = vmul.f32 %v1510_v24, %v1502_v7  ;;  %v985_v32 = vpop.permute.xlu1 %984 }
 0x41c   : > { %v990_v34 = vsel %vm655_vm3, %v985_v32, 0 }
 0x41d   : > { %v762_v26 = vpack.c.bf16 %v761_v25, %v761_v25  ;;  %1033 = vrot.lane.b32.xlu1 %v761_v25, %s1781_s21 }
 0x41f   : > { %v980_v27 = vpop.xlane.xlu0 %979  ;;  %1374 = vmatmul.mubr.msk.bf16.vlgmr.msra.gmra.mrb[12].mxu0 %vm593_vm2, %v762_v26 }
 0x420   : > { %1513 = vrcp.f32 %v980_v27  ;;  %1385 = vmatprep.mubr.msk.bf16.mxu0 %vm1777_vm0, %v1776_v0 }
 0x422   : > { %v1512_v28 = vpop.eup %1511 }
 0x423   : > { %v875_v29 = vpop.permute.xlu0 %874  ;;  %v872_v30 = vmul.f32 %v1512_v28, %v1504_v12 }
 0x424   : > { %v880_v31 = vsel %vm655_vm3, %v875_v29, 0 }
 0x425   : > { %1037 = vrot.lane.b32.xlu0 %v872_v30, %s1782_s22  ;;  %v873_v33 = vpack.c.bf16 %v872_v30, %v872_v30  ;;  %1384 = vmatpush3.bf16.msra.mxu0 %v880_v31 }
 0x426   : > { %1395 = vmatprep.subr.bf16.mxu0 %v1776_v0 }
 0x428   : > { %1386 = vmatmul.mubr.msk.bf16.vlgmr.msra.gmra.mrb[16].mxu0 %vm593_vm2, %v873_v33 }
 0x429   : > { %1396 = vmatpush3.bf16.msra.mxu0 %v990_v34  ;;  %1397 = vmatprep.mubr.msk.bf16.mxu0 %vm1777_vm0, %v1776_v0 }
 0x42a   : > { %v1514_v35 = vpop.eup %1513 }
 0x42b   : > { %v982_v36 = vmul.f32 %v1514_v35, %v1506_v14 }
 0x42d   : > { %v983_v37 = vpack.c.bf16 %v982_v36, %v982_v36  ;;  %1041 = vrot.lane.b32.xlu1 %v982_v36, %s1783_s18 }
 0x430   : > { %1398 = vmatmul.mubr.msk.bf16.vlgmr.msra.gmra.mrb[20].mxu0 %vm593_vm2, %v983_v37 }
 0x480   : > { %v2164_v38 = vpop.f32.mrb[8].mxu0 }
 0x481   : > { %v1363_v39 = vpop.f32.mrb[9].mxu0 }
 0x482   : > { %v696_v40 = vpop.f32.mrb[10].mxu0 }
 0x483   : > { %v1364_v41 = vpop.f32.mrb[11].mxu0 }
 0x48f   : > { %v1034_v42 = vpop.permute.xlu1 %1033 }
 0x490   : > { %v1044_v0 = vsel %vm593_vm2, %v650_v19, %v1034_v42 }
 0x497   : > { %v1038_v43 = vpop.permute.xlu0 %1037 }
 0x498   : > { %v1046_v44 = vsel %vm1045_vm4, %v1044_v0, %v1038_v43 }
 0x49f   : > { %v1042_v45 = vpop.permute.xlu1 %1041 }
 0x4a0   : > { %v1048_v46 = vsel %vm1047_vm5, %v1046_v44, %v1042_v45 }
 0x4a1   : > { %1049 = vst.msk [vmem:[%s397_s16] sm:$0xff] %vm436_vm1, %v1048_v46 }
 0x4f2   : > { %v806_v47 = vpop.f32.mrb[12].mxu0 }
 0x4f3   : > { %1051 = vrot.lane.b32.xlu0 %v806_v47, %s1781_s21  ;;  %v1375_v48 = vpop.f32.mrb[13].mxu0 }
 0x4f4   : > { %v809_v49 = vpop.f32.mrb[14].mxu0 }
 0x4f5   : > { %v1376_v50 = vpop.f32.mrb[15].mxu0 }
 0x4f6   : > { %1674 = shalt.err (!%p1671_p2)
}
 0x4f7   : > { %s1675_s23 = scalar_lea.hbm %s2178_s20, 128  ;;  %s1679_s21 = scalar_lea.hbm %s2261_s6, 256 }
 0x4f8   : > { %p1676_p5 = scmp.ne.s32.totalorder %s2178_s20, %s1675_s23  ;;  %p1680_p0 = scmp.lt.u32.totalorder %s2178_s20, %s2261_s6 }
 0x4f9   : > { %p1681_p7 = scmp.lt.u32.totalorder %s1679_s21, %s1675_s23  ;;  %p1683_p6 = scmp.lt.u32.totalorder %s1675_s23, %s2178_s20 }
 0x4fa   : > { %p1677_p12 = pnand %p1676_p5, %p2308_p10 }
 0x4fb   : > { %p1682_p1 = por %p1681_p7, %p1680_p0 }
 0x4fc   : > { %p1678_p3 = pneg %p1677_p12 }
 0x4fd   : > { %p1684_p8 = por %p1683_p6, %p1682_p1 }
 0x4ff   : > { %p1685_p9 = pnand %p1684_p8, %p1678_p3 }
 0x501   : > { %1688 = shalt.err (!%p1685_p9)
}
 0x502   : > { %1415 = dma.vmem_to_hbm [thread:$0]  (%p2308_p10), %s1086_s11, 128, %s2178_s20, %s1067_s27   ;;  %v916_v51 = vpop.f32.mrb[16].mxu0 }
 0x503   : > { %1055 = vrot.lane.b32.xlu1 %v916_v51, %s1782_s22  ;;  %v1387_v52 = vpop.f32.mrb[17].mxu0  ;;  %s404_s9 = scalar_lea.vmem [#allocation12], %s2062_s1  ;;  %s2209_s11 = scalar_lea.hbm %s2262_s7, %s1300_s10 }
 0x504   : > { %v919_v53 = vpop.f32.mrb[18].mxu0  ;;  %s1098_s30 = sshll.u32 %s404_s9, 4  ;;  %s1072_s1 = scalar_lea.sflag [#allocation13], %s2059_s3  ;;  %s2211_s30 = int_to_ptr.vmem [resolvable:$true] %s1098_s30 }
 0x505   : > { %v1388_v54 = vpop.f32.mrb[19].mxu0  ;;  %s1785_s28 = smov [#allocation12]  }
 0x506   : > { %v1026_v55 = vpop.f32.mrb[20].mxu0  ;;  %s1693_s27 = sshll.u32 %s1785_s28, 4  ;;  %s1694_s27 = int_to_ptr.vmem [resolvable:$false] %s1693_s27 }
 0x507   : > { %1059 = vrot.lane.b32.xlu0 %v1026_v55, %s1783_s18  ;;  %v1399_v56 = vpop.f32.mrb[21].mxu0  ;;  %s1689_s18 = scalar_lea.vmem %s2211_s30, 128  ;;  %s1695_s10 = scalar_lea.vmem %s1694_s27, 256 }
 0x508   : > { %v1029_v57 = vpop.f32.mrb[22].mxu0  ;;  %p1690_p11 = scmp.ne.s32.totalorder %s2211_s30, %s1689_s18  ;;  %p1696_p2 = scmp.lt.s32.totalorder %s2211_s30, %s1694_s27 }
 0x509   : > { %v1400_v58 = vpop.f32.mrb[23].mxu0  ;;  %p1697_p5 = scmp.lt.s32.totalorder %s1695_s10, %s1689_s18 }
 0x50a   : > { %p1691_p4 = pnand %p1690_p11, %p2308_p10 }
 0x50b   : > { %p1698_p12 = por %p1697_p5, %p1696_p2 }
 0x50c   : > { %p1692_p13 = pneg %p1691_p4 }
 0x50e   : > { %p1699_p3 = pnand %p1698_p12, %p1692_p13 }
 0x565   : > { %v1052_v59 = vpop.permute.xlu0 %1051 }
 0x566   : > { %v1062_v61 = vsel %vm593_vm2, %v2164_v38, %v1052_v59 }
 0x575   : > { %v1056_v60 = vpop.permute.xlu1 %1055 }
 0x576   : > { %v1063_v62 = vsel %vm1045_vm4, %v1062_v61, %v1056_v60 }
 0x579   : > { %v1060_v63 = vpop.permute.xlu0 %1059 }
 0x57a   : > { %v1064_v1 = vsel %vm1047_vm5, %v1063_v62, %v1060_v63 }
 0x57b   : > { %1065 = vst.msk [vmem:[%s404_s9] sm:$0xff] %vm436_vm1, %v1064_v1 }
 0x57c   : > { %1702 = shalt.err (!%p1699_p3)
}
 0x57d   : > { %s1703_s3 = scalar_lea.hbm %s2209_s11, 128  ;;  %s1707_s13 = scalar_lea.hbm %s2262_s7, 256 }
 0x57e   : > { %p1704_p0 = scmp.ne.s32.totalorder %s2209_s11, %s1703_s3  ;;  %p1708_p6 = scmp.lt.u32.totalorder %s2209_s11, %s2262_s7 }
 0x57f   : > { %p1709_p8 = scmp.lt.u32.totalorder %s1707_s13, %s1703_s3  ;;  %p1711_p11 = scmp.lt.u32.totalorder %s1703_s3, %s2209_s11 }
 0x580   : > { %p1705_p7 = pnand %p1704_p0, %p2308_p10 }
 0x581   : > { %p1710_p9 = por %p1709_p8, %p1708_p6 }
 0x582   : > { %p1706_p1 = pneg %p1705_p7 }
 0x583   : > { %p1712_p4 = por %p1711_p11, %p1710_p9 }
 0x585   : > { %p1713_p13 = pnand %p1712_p4, %p1706_p1 }
 0x587   : > { %1716 = shalt.err (!%p1713_p13)
}
 0x588   : > { %1416 = dma.vmem_to_hbm [thread:$0]  (%p2308_p10), %s2211_s30, 128, %s2209_s11, %s1072_s1  }
 0x589 PF: > { %s2309_s29 = sld [smem:[#allocation19_spill]]  ;;  %s1110_s21 = sand.u32 1, %s1755_s24  }
 0x58a   : > { %p2310_p2 = scmp.ne.s32.totalorder %s2284_s8, 0  ;;  %s1111_s16 = scalar_lea.sflag [#allocation4], %s1110_s21 }
 0x58f   : > { %p2311_p5 = scmp.ge.s32.totalorder %s2309_s29, 2 }
 0x591   : > { %p1437_p12 = pnand %p2311_p5, %p2310_p2 }
 0x593   : > { %1746 = dma.done.wait (!%p1437_p12), %s1111_s16, 128  }
 0x594   : > { %1748 = vsyncadd (!%p1437_p12), %s1111_s16, 4294967168  ;;  %s1120_s15 = scalar_lea.sflag [#allocation13], %s1110_s21 }
 0x595   : > { %1750 = dma.done.wait (!%p1437_p12), %s1120_s15, 128  }
 0x596   : > { %1752 = vsyncadd (!%p1437_p12), %s1120_s15, 4294967168  ;;  %s2312_s27 = sld [smem:[#allocation20_spill]]  ;;  %s2313_s19 = sld [smem:[#allocation21_spill]] }
 0x597   : > { %s2314_s24 = smov %s1759_s25  ;;  %s2315_s25 = smov %s1763_s26 }
 0x59c   : > { %p28_p10 = scmp.ge.s32.totalorder %s2312_s27, 4   ;;  %s2316_s26 = smov %s2313_s19 }
 0x59e   :  { %30 = sbr.rel (!%p28_p10) target bundleno = 13 (0xd), region = 138 }
 0x5a5   :  { %1125 = vsyncpa [#allocation3], 1 }
 0x5a6   :  { %1127 = vsyncpa [#allocation3 + $0x1], 1 }
 0x5a7   :  { %1128 = vsyncpa [#allocation6], 1 }
 0x5a8   :  { %1130 = vsyncpa [#allocation6 + $0x1], 1 }
 0x5a9   :  { %1131 = vsyncpa [#allocation9], 1 }
 0x5aa   :  { %1132 = vsyncpa [#allocation4], 1 }
 0x5ab   :  { %1134 = vsyncpa [#allocation4 + $0x1], 1 }
 0x5ac   :  { %1135 = vsyncpa [#allocation13], 1 }
 0x5ad   :  { %1137 = vsyncpa [#allocation13 + $0x1], 1 }

</bundles_post_ra>
